<compile_context>
chip_gen: v7x
topology: tpu7x:2x2x1
jax: 0.10.0
libtpu: 0.0.40
codegen_flags: <defaults>
</compile_context>

<pallas_src>
import jax
import jax.numpy as jnp
import numpy as np
from jax.experimental import pallas as pl
from jax.experimental.pallas import tpu as pltpu


def _u_kernel(coef_ref, s0r_ref, s0i_ref, s1r_ref, s1i_ref,
              o0r_ref, o0i_ref, o1r_ref, o1i_ref):
    """coef_ref: (8, TCB) f32; state/out refs: (TA, TCB) f32 blocks."""
    c = coef_ref[...]                        # (8, TCB), VMEM-resident across grid
    u00r, u00i = c[0:1, :], c[1:2, :]        # (1, TCB) -> broadcast over sublanes
    u01r, u01i = c[2:3, :], c[3:4, :]
    u10r, u10i = c[4:5, :], c[5:6, :]
    u11r, u11i = c[6:7, :], c[7:8, :]

    s0r = s0r_ref[...]
    s0i = s0i_ref[...]
    s1r = s1r_ref[...]
    s1i = s1i_ref[...]

    # out0 = u00 * s0 + u01 * s1 ; out1 = u10 * s0 + u11 * s1  (complex, split re/im)
    o0r_ref[...] = u00r * s0r - u00i * s0i + u01r * s1r - u01i * s1i
    o0i_ref[...] = u00r * s0i + u00i * s0r + u01r * s1i + u01i * s1r
    o1r_ref[...] = u10r * s0r - u10i * s0i + u11r * s1r - u11i * s1i
    o1i_ref[...] = u10r * s0i + u10i * s0r + u11r * s1i + u11i * s1r


_MAX_SINGLE_LANE_TILE = 4096     # if C*B <= this, a single lane tile is used
_LANE_TILE_TARGET = 2048         # preferred lane-tile width (multiple of 128)
_BLOCK_ELEM_TARGET = 64 * 1024   # ~256 KiB f32 per operand block


def _choose_tiles(A, C, B):
    """Pick (TA, TCB) with TA | A (mult of 8 or == A) and TCB | C*B (mult of 128 or == C*B)."""
    CB = C * B
    if CB <= _MAX_SINGLE_LANE_TILE:
        tcb = CB
    else:
        # Lane tile = B * 2**m: multiple of B (so the per-batch coefficient
        # pattern repeats identically in every tile) and, once big enough, a
        # multiple of 128 (unmasked stores).  C is a power of two, so it divides C*B.
        tcb = B
        while tcb < CB and (tcb < _LANE_TILE_TARGET or tcb % 128 != 0):
            tcb *= 2
    if A <= 8:
        ta = A
    else:
        ta = 8
        while ta < A and ta * tcb < _BLOCK_ELEM_TARGET:
            ta *= 2
    return ta, tcb


def _u_pallas_apply(coef, s0r, s0i, s1r, s1i, ta, tcb):
    A, CB = s0r.shape
    grid = (A // ta, CB // tcb)
    state_spec = pl.BlockSpec((ta, tcb), lambda i, j: (i, j))
    coef_spec = pl.BlockSpec((8, tcb), lambda i, j: (0, 0))   # resident, never re-DMA'd
    out_shape = jax.ShapeDtypeStruct((A, CB), jnp.float32)
    return pl.pallas_call(
        _u_kernel,
        out_shape=(out_shape,) * 4,
        grid=grid,
        in_specs=[coef_spec, state_spec, state_spec, state_spec, state_spec],
        out_specs=(state_spec,) * 4,
        compiler_params=pltpu.CompilerParams(
            dimension_semantics=("parallel", "parallel")),
    )(coef, s0r, s0i, s1r, s1i)


class U:
    """JAX/Pallas port of pyqtorch.modules.parametric.U (forward pass)."""
    n_params = 3

    def __init__(self, qubits, n_qubits):
        # TODO(synk): only single-target-qubit application is implemented
        # (the U gate matrix is 2x2, matching pyqtorch's usage).
        assert len(qubits) == 1
        self.qubits = list(qubits)
        self.n_qubits = n_qubits

    def _coefficients(self, thetas, batch, tcb):
        thetas = jnp.asarray(thetas, dtype=jnp.float32)
        if thetas.ndim == 1:
            thetas = thetas[:, None]
        assert thetas.shape[0] == 3
        phi, theta, omega = thetas[0], thetas[1], thetas[2]
        hs = 0.5 * (phi + omega)
        hd = 0.5 * (phi - omega)
        ct = jnp.cos(0.5 * theta)
        st = jnp.sin(0.5 * theta)
        tpr, tpi = jnp.cos(hs), -jnp.sin(hs)   # t_plus  = exp(-i(phi+omega)/2)
        tmr, tmi = jnp.cos(hd), -jnp.sin(hd)   # t_minus = exp(-i(phi-omega)/2)
        # U = [[ct*t_plus, -st*conj(t_minus)], [st*t_minus, ct*conj(t_plus)]]
        coef = jnp.stack([ct * tpr, ct * tpi,           # u00 re/im
                          -st * tmr, st * tmi,          # u01 re/im
                          st * tmr, st * tmi,           # u10 re/im
                          ct * tpr, -ct * tpi], axis=0)  # u11 re/im -> (8, Bt)
        bt = coef.shape[1]
        if bt == 1 and batch > 1:
            coef = jnp.broadcast_to(coef, (8, batch))    # pyqtorch-style broadcast
        elif bt != batch:
            raise ValueError(f"thetas batch {bt} incompatible with state batch {batch}")
        # Along the contiguous (C, B) tail the batch index is fastest, so the
        # per-batch coefficient repeats with period `batch` along lanes.
        reps = tcb // batch
        return jnp.tile(coef, (1, reps))                 # (8, TCB)

    def forward(self, state, thetas):
        state = jnp.asarray(state)
        n = self.n_qubits
        q = self.qubits[0]
        batch = state.shape[-1]
        A = 2 ** q
        C = 2 ** (n - 1 - q)
        CB = C * batch
        # TODO(synk): when the target qubit is the last one and batch is small,
        # the lane axis (C*B) is narrow; a relayout fallback could improve that case.

        ta, tcb = _choose_tiles(A, C, batch)
        coef = self._coefficients(thetas, batch, tcb)

        # Pure reshape (no transpose): [qubits before target] -> A,
        # target qubit -> middle axis of size 2, [qubits after target, batch] -> C*B.
        sview = jnp.reshape(state, (A, 2, CB))
        s0 = sview[:, 0, :]
        s1 = sview[:, 1, :]
        s0r = jnp.real(s0).astype(jnp.float32)
        s0i = jnp.imag(s0).astype(jnp.float32)
        s1r = jnp.real(s1).astype(jnp.float32)
        s1i = jnp.imag(s1).astype(jnp.float32)

        o0r, o0i, o1r, o1i = _u_pallas_apply(coef, s0r, s0i, s1r, s1i, ta, tcb)

        o0 = jax.lax.complex(o0r, o0i)
        o1 = jax.lax.complex(o1r, o1i)
        out = jnp.stack([o0, o1], axis=1)        # (A, 2, CB) complex64
        return jnp.reshape(out, state.shape)

    __call__ = forward


def _u_reference(state, thetas, q):
    """Pure-JAX reference mirroring the PyTorch forward semantics."""
    thetas = jnp.asarray(thetas, dtype=jnp.float32)
    if thetas.ndim == 1:
        thetas = thetas[:, None]
    phi, theta, omega = thetas[0], thetas[1], thetas[2]
    tp = jnp.exp(-1j * (phi + omega) / 2)
    tm = jnp.exp(-1j * (phi - omega) / 2)
    ct = jnp.cos(theta / 2)
    st = jnp.sin(theta / 2)
    u00 = ct * tp
    u01 = -st * jnp.conj(tm)
    u10 = st * tm
    u11 = ct * jnp.conj(tp)
    s = jnp.moveaxis(state, q, 0)               # (2, ..., batch) — batch stays last
    s0, s1 = s[0], s[1]
    o0 = u00 * s0 + u01 * s1                    # coefficients broadcast over batch
    o1 = u10 * s0 + u11 * s1
    out = jnp.stack([o0, o1], axis=0)
    return jnp.moveaxis(out, 0, q)


if __name__ == "__main__":
    n_qubits = 4
    batch = 8

    key = jax.random.PRNGKey(0)
    k1, k2, k3 = jax.random.split(key, 3)
    shape = tuple([2] * n_qubits + [batch])
    state = (jax.random.normal(k1, shape, dtype=jnp.float32)
             + 1j * jax.random.normal(k2, shape, dtype=jnp.float32)
             ).astype(jnp.complex64)
    # normalize per batch element (quantum state convention)
    norm = jnp.sqrt(jnp.sum(jnp.abs(state) ** 2,
                            axis=tuple(range(n_qubits)), keepdims=True))
    state = state / norm
    thetas = jax.random.uniform(k3, (3, batch), dtype=jnp.float32,
                                minval=-jnp.pi, maxval=jnp.pi)

    # Exercise leading / middle / trailing target qubits, plus 1-D thetas broadcast.
    cases = [([0], thetas), ([1], thetas), ([n_qubits - 1], thetas),
             ([1], thetas[:, 0])]
    for qubits, th in cases:
        gate = U(qubits, n_qubits)
        out = jax.block_until_ready(jax.jit(gate.forward)(state, th))
        ref = _u_reference(state, th, qubits[0])
        np.testing.assert_allclose(np.asarray(out), np.asarray(ref),
                                   rtol=1e-5, atol=1e-5)

    print("KERNEL_OK")
</pallas_src>

<mosaic_0001>
module attributes {stable_mosaic.version = 11 : i64} {
  func.func @_u_kernel(%arg0: i32, %arg1: i32, %arg2: memref<8x64xf32, #tpu.memory_space<vmem>>, %arg3: memref<1x64xf32, #tpu.memory_space<vmem>>, %arg4: memref<1x64xf32, #tpu.memory_space<vmem>>, %arg5: memref<1x64xf32, #tpu.memory_space<vmem>>, %arg6: memref<1x64xf32, #tpu.memory_space<vmem>>, %arg7: memref<1x64xf32, #tpu.memory_space<vmem>>, %arg8: memref<1x64xf32, #tpu.memory_space<vmem>>, %arg9: memref<1x64xf32, #tpu.memory_space<vmem>>, %arg10: memref<1x64xf32, #tpu.memory_space<vmem>>) attributes {dimension_semantics = [#tpu.dimension_semantics<parallel>, #tpu.dimension_semantics<parallel>], iteration_bounds = array<i64: 1, 1>, scalar_prefetch = 0 : i64, scratch_operands = 0 : i64, tpu.core_type = #tpu.core_type<tc>, window_params = [{pipeline_mode = #tpu.pipeline_mode<synchronous>, transform_indices = @transform_0, window_bounds = array<i64: 8, 64>}, {transform_indices = @transform_1, window_bounds = array<i64: 1, 64>}, {transform_indices = @transform_2, window_bounds = array<i64: 1, 64>}, {transform_indices = @transform_3, window_bounds = array<i64: 1, 64>}, {transform_indices = @transform_4, window_bounds = array<i64: 1, 64>}, {transform_indices = @transform_5, window_bounds = array<i64: 1, 64>}, {transform_indices = @transform_6, window_bounds = array<i64: 1, 64>}, {transform_indices = @transform_7, window_bounds = array<i64: 1, 64>}, {transform_indices = @transform_8, window_bounds = array<i64: 1, 64>}]} {
    %c0 = arith.constant 0 : index
    %c0_0 = arith.constant 0 : index
    %0 = vector.load %arg2[%c0, %c0_0] : memref<8x64xf32, #tpu.memory_space<vmem>>, vector<8x64xf32>
    %1 = vector.extract_strided_slice %0 {offsets = [0, 0], sizes = [1, 64], strides = [1, 1]} : vector<8x64xf32> to vector<1x64xf32>
    %2 = vector.extract_strided_slice %0 {offsets = [1, 0], sizes = [1, 64], strides = [1, 1]} : vector<8x64xf32> to vector<1x64xf32>
    %3 = vector.extract_strided_slice %0 {offsets = [2, 0], sizes = [1, 64], strides = [1, 1]} : vector<8x64xf32> to vector<1x64xf32>
    %4 = vector.extract_strided_slice %0 {offsets = [3, 0], sizes = [1, 64], strides = [1, 1]} : vector<8x64xf32> to vector<1x64xf32>
    %5 = vector.extract_strided_slice %0 {offsets = [4, 0], sizes = [1, 64], strides = [1, 1]} : vector<8x64xf32> to vector<1x64xf32>
    %6 = vector.extract_strided_slice %0 {offsets = [5, 0], sizes = [1, 64], strides = [1, 1]} : vector<8x64xf32> to vector<1x64xf32>
    %7 = vector.extract_strided_slice %0 {offsets = [6, 0], sizes = [1, 64], strides = [1, 1]} : vector<8x64xf32> to vector<1x64xf32>
    %8 = vector.extract_strided_slice %0 {offsets = [7, 0], sizes = [1, 64], strides = [1, 1]} : vector<8x64xf32> to vector<1x64xf32>
    %c0_1 = arith.constant 0 : index
    %c0_2 = arith.constant 0 : index
    %9 = vector.load %arg3[%c0_1, %c0_2] : memref<1x64xf32, #tpu.memory_space<vmem>>, vector<1x64xf32>
    %c0_3 = arith.constant 0 : index
    %c0_4 = arith.constant 0 : index
    %10 = vector.load %arg4[%c0_3, %c0_4] : memref<1x64xf32, #tpu.memory_space<vmem>>, vector<1x64xf32>
    %c0_5 = arith.constant 0 : index
    %c0_6 = arith.constant 0 : index
    %11 = vector.load %arg5[%c0_5, %c0_6] : memref<1x64xf32, #tpu.memory_space<vmem>>, vector<1x64xf32>
    %c0_7 = arith.constant 0 : index
    %c0_8 = arith.constant 0 : index
    %12 = vector.load %arg6[%c0_7, %c0_8] : memref<1x64xf32, #tpu.memory_space<vmem>>, vector<1x64xf32>
    %13 = arith.mulf %1, %9 : vector<1x64xf32>
    %14 = arith.mulf %2, %10 : vector<1x64xf32>
    %15 = arith.subf %13, %14 : vector<1x64xf32>
    %16 = arith.mulf %3, %11 : vector<1x64xf32>
    %17 = arith.addf %15, %16 : vector<1x64xf32>
    %18 = arith.mulf %4, %12 : vector<1x64xf32>
    %19 = arith.subf %17, %18 : vector<1x64xf32>
    %c0_9 = arith.constant 0 : index
    %c0_10 = arith.constant 0 : index
    %20 = vector.load %arg7[%c0_9, %c0_10] : memref<1x64xf32, #tpu.memory_space<vmem>>, vector<1x64xf32>
    tpu.vector_store %arg7[%c0_9, %c0_10], %19 {strides = array<i32>} : memref<1x64xf32, #tpu.memory_space<vmem>>, vector<1x64xf32>,
    %21 = arith.mulf %1, %10 : vector<1x64xf32>
    %22 = arith.mulf %2, %9 : vector<1x64xf32>
    %23 = arith.addf %21, %22 : vector<1x64xf32>
    %24 = arith.mulf %3, %12 : vector<1x64xf32>
    %25 = arith.addf %23, %24 : vector<1x64xf32>
    %26 = arith.mulf %4, %11 : vector<1x64xf32>
    %27 = arith.addf %25, %26 : vector<1x64xf32>
    %c0_11 = arith.constant 0 : index
    %c0_12 = arith.constant 0 : index
    %28 = vector.load %arg8[%c0_11, %c0_12] : memref<1x64xf32, #tpu.memory_space<vmem>>, vector<1x64xf32>
    tpu.vector_store %arg8[%c0_11, %c0_12], %27 {strides = array<i32>} : memref<1x64xf32, #tpu.memory_space<vmem>>, vector<1x64xf32>,
    %29 = arith.mulf %5, %9 : vector<1x64xf32>
    %30 = arith.mulf %6, %10 : vector<1x64xf32>
    %31 = arith.subf %29, %30 : vector<1x64xf32>
    %32 = arith.mulf %7, %11 : vector<1x64xf32>
    %33 = arith.addf %31, %32 : vector<1x64xf32>
    %34 = arith.mulf %8, %12 : vector<1x64xf32>
    %35 = arith.subf %33, %34 : vector<1x64xf32>
    %c0_13 = arith.constant 0 : index
    %c0_14 = arith.constant 0 : index
    %36 = vector.load %arg9[%c0_13, %c0_14] : memref<1x64xf32, #tpu.memory_space<vmem>>, vector<1x64xf32>
    tpu.vector_store %arg9[%c0_13, %c0_14], %35 {strides = array<i32>} : memref<1x64xf32, #tpu.memory_space<vmem>>, vector<1x64xf32>,
    %37 = arith.mulf %5, %10 : vector<1x64xf32>
    %38 = arith.mulf %6, %9 : vector<1x64xf32>
    %39 = arith.addf %37, %38 : vector<1x64xf32>
    %40 = arith.mulf %7, %12 : vector<1x64xf32>
    %41 = arith.addf %39, %40 : vector<1x64xf32>
    %42 = arith.mulf %8, %11 : vector<1x64xf32>
    %43 = arith.addf %41, %42 : vector<1x64xf32>
    %c0_15 = arith.constant 0 : index
    %c0_16 = arith.constant 0 : index
    %44 = vector.load %arg10[%c0_15, %c0_16] : memref<1x64xf32, #tpu.memory_space<vmem>>, vector<1x64xf32>
    tpu.vector_store %arg10[%c0_15, %c0_16], %43 {strides = array<i32>} : memref<1x64xf32, #tpu.memory_space<vmem>>, vector<1x64xf32>,
    return
  }
  func.func @transform_0(%arg0: i32, %arg1: i32) -> (i32, i32) {
    %c0_i32 = arith.constant 0 : i32
    %c0_i32_0 = arith.constant 0 : i32
    %c0_i32_1 = arith.constant 0 : i32
    return %c0_i32, %c0_i32_0 : i32, i32
  }
  func.func @transform_1(%arg0: i32, %arg1: i32) -> (i32, i32) {
    %c0_i32 = arith.constant 0 : i32
    return %arg0, %arg1 : i32, i32
  }
  func.func @transform_2(%arg0: i32, %arg1: i32) -> (i32, i32) {
    %c0_i32 = arith.constant 0 : i32
    return %arg0, %arg1 : i32, i32
  }
  func.func @transform_3(%arg0: i32, %arg1: i32) -> (i32, i32) {
    %c0_i32 = arith.constant 0 : i32
    return %arg0, %arg1 : i32, i32
  }
  func.func @transform_4(%arg0: i32, %arg1: i32) -> (i32, i32) {
    %c0_i32 = arith.constant 0 : i32
    return %arg0, %arg1 : i32, i32
  }
  func.func @transform_5(%arg0: i32, %arg1: i32) -> (i32, i32) {
    %c0_i32 = arith.constant 0 : i32
    return %arg0, %arg1 : i32, i32
  }
  func.func @transform_6(%arg0: i32, %arg1: i32) -> (i32, i32) {
    %c0_i32 = arith.constant 0 : i32
    return %arg0, %arg1 : i32, i32
  }
  func.func @transform_7(%arg0: i32, %arg1: i32) -> (i32, i32) {
    %c0_i32 = arith.constant 0 : i32
    return %arg0, %arg1 : i32, i32
  }
  func.func @transform_8(%arg0: i32, %arg1: i32) -> (i32, i32) {
    %c0_i32 = arith.constant 0 : i32
    return %arg0, %arg1 : i32, i32
  }
}

</mosaic_0001>

<bundles_post_ra>
// kernel: tile.9
= control target key start
LH: loop header
LB: loop body
LE: loop exit
PB: predicated region body
PF: predicated region fallthrough
CT: control target
= control target key end

     0   :  { %vm4_vm0 = vcmask 1047556   ;;  %s99_s14 = smov 56   ;;  %s100_s19 = smov 40   ;;  %vm6_vm1 = vcmask 64512   ;;  %vm16_vm2 = vcmask 523712   ;;  %vm26_vm3 = vcmask 458112   ;;  %s196_s0 = inlined_call_operand.vmem [shape: f32[8,8,8], index: 0, kind: input, shape index: {}]   ;;  %s197_s1 = inlined_call_operand.vmem [shape: f32[8,64], index: 1, kind: output, shape index: {}]  }
   0x1   :  { %v78_v0 = vld [vmem:[%s196_s0 + $0x7] ss:$8 sm:$0xf]   ;;  %v82_v3 = vld [vmem:[%s196_s0 + $0x5] ss:$8 sm:$0xf]  }
   0x2   :  { %v79_v1 = vld [vmem:[%s196_s0 + $0x7] ss:$8 sm:$0xf0]   ;;  %v83_v4 = vld [vmem:[%s196_s0 + $0x5] ss:$8 sm:$0xf0]  }
   0x3   :  { %v13_v2 = vsel %vm4_vm0, %v79_v1, %v78_v0  ;;  %v33_v5 = vsel %vm4_vm0, %v83_v4, %v82_v3  ;;  %v80_v6 = vld [vmem:[%s196_s0 + $0x6] ss:$8 sm:$0xf]   ;;  %v84_v9 = vld [vmem:[%s196_s0 + $0x4] ss:$8 sm:$0xf]  }
   0x4   :  { %14 = vrot.lane.b32.xlu0 %v13_v2, %s99_s14  ;;  %v81_v7 = vld [vmem:[%s196_s0 + $0x6] ss:$8 sm:$0xf0]   ;;  %34 = vrot.lane.b32.xlu1 %v33_v5, %s100_s19  ;;  %v85_v10 = vld [vmem:[%s196_s0 + $0x4] ss:$8 sm:$0xf0]  }
   0x5   :  { %v23_v8 = vsel %vm4_vm0, %v81_v7, %v80_v6  ;;  %v86_v11 = vld [vmem:[%s196_s0 + $0x3] ss:$8 sm:$0xf]   ;;  %v43_v12 = vsel %vm4_vm0, %v85_v10, %v84_v9  ;;  %s101_s28 = smov 48   ;;  %s102_s4 = smov 32   ;;  %vm36_vm4 = vcmask 392512  }
   0x6   :  { %v87_v13 = vld [vmem:[%s196_s0 + $0x3] ss:$8 sm:$0xf0]   ;;  %v88_v14 = vld [vmem:[%s196_s0 + $0x2] ss:$8 sm:$0xf]  }
   0x7   :  { %v89_v15 = vld [vmem:[%s196_s0 + $0x2] ss:$8 sm:$0xf0]   ;;  %v53_v16 = vsel %vm4_vm0, %v87_v13, %v86_v11  ;;  %v90_v17 = vld [vmem:[%s196_s0 + $0x1] ss:$8 sm:$0xf]  }
   0x8   :  { %24 = vrot.lane.b32.xlu0 %v23_v8, %s101_s28  ;;  %44 = vrot.lane.b32.xlu1 %v43_v12, %s102_s4  ;;  %v63_v18 = vsel %vm4_vm0, %v89_v15, %v88_v14  ;;  %v91_v19 = vld [vmem:[%s196_s0 + $0x1] ss:$8 sm:$0xf0]   ;;  %v2_v20 = vld [vmem:[%s196_s0] ss:$8 sm:$0xf]  }
   0x9   :  { %v3_v21 = vld [vmem:[%s196_s0] ss:$8 sm:$0xf0]   ;;  %s103_s0 = smov 24   ;;  %s104_s13 = smov 16   ;;  %v73_v23 = vsel %vm4_vm0, %v91_v19, %v90_v17  ;;  %vm46_vm5 = vcmask 326912  }
   0xa   :  { %v5_v22 = vsel %vm4_vm0, %v3_v21, %v2_v20  ;;  %s105_s16 = smov 8   ;;  %vm56_vm6 = vcmask 261312   ;;  %vm66_vm7 = vcmask 195712   ;;  %vm76_vm8 = vcmask 130112  }
   0xb   :  { %7 = vst.msk [vmem:[%s197_s1] sm:$0xff] %vm6_vm1, %v5_v22  }
   0xc   :  { %54 = vrot.lane.b32.xlu0 %v53_v16, %s103_s0  ;;  %64 = vrot.lane.b32.xlu1 %v63_v18, %s104_s13 }
  0x10   :  { %74 = vrot.lane.b32.xlu0 %v73_v23, %s105_s16 }
  0x76   :  { %v15_v24 = vpop.permute.xlu0 %14   ;;  %v35_v25 = vpop.permute.xlu1 %34  }
  0x77   :  { %17 = vst.msk [vmem:[%s197_s1] sm:$0xff] %vm16_vm2, %v15_v24  }
  0x7a   :  { %v25_v26 = vpop.permute.xlu0 %24   ;;  %v45_v27 = vpop.permute.xlu1 %44  }
  0x7b   :  { %27 = vst.msk [vmem:[%s197_s1] sm:$0xff] %vm26_vm3, %v25_v26  }
  0x7c   :  { %37 = vst.msk [vmem:[%s197_s1] sm:$0xff] %vm36_vm4, %v35_v25  }
  0x7d   :  { %47 = vst.msk [vmem:[%s197_s1] sm:$0xff] %vm46_vm5, %v45_v27  }
  0x7e   :  { %v55_v28 = vpop.permute.xlu0 %54   ;;  %v65_v29 = vpop.permute.xlu1 %64  }
  0x7f   :  { %57 = vst.msk [vmem:[%s197_s1] sm:$0xff] %vm56_vm6, %v55_v28  }
  0x80   :  { %67 = vst.msk [vmem:[%s197_s1] sm:$0xff] %vm66_vm7, %v65_v29  }
  0x82   :  { %v75_v30 = vpop.permute.xlu0 %74  }
  0x83   :  { %77 = vst.msk [vmem:[%s197_s1] sm:$0xff] %vm76_vm8, %v75_v30  }

// kernel: custom-call.1
= control target key start
LH: loop header
LB: loop body
LE: loop exit
PB: predicated region body
PF: predicated region fallthrough
CT: control target
= control target key end

     0   :  { %s59_s0 = inlined_call_operand.hbm [shape: c64[2,2,2,2,8], index: 0, kind: input, shape index: {}]   ;;  %s60_s1 = inlined_call_operand.vmem [shape: f32[2,2,2,2,8], index: 1, kind: output, shape index: {}]  }
   0x1   :  { %s2_s8 = scalar_lea.hbm %s59_s0, 256 }
   0x2   :  { %3 = vsyncpa [#allocation0], 0  ;;  %s4_s11 = sshll.u32 %s60_s1, 4  ;;  %s34_s14 = scalar_lea.hbm %s59_s0, 512  ;;  %s5_s11 = int_to_ptr.vmem [resolvable:$true] %s4_s11 }
   0x3   :  { %p11_p0 = scmp.ne.s32.totalorder %s2_s8, %s34_s14  ;;  %p13_p1 = scmp.lt.u32.totalorder %s2_s8, %s59_s0 }
   0x4   :  { %p14_p2 = scmp.lt.u32.totalorder %s34_s14, %s34_s14  ;;  %p16_p4 = scmp.lt.u32.totalorder %s34_s14, %s2_s8 }
   0x6   :  { %p15_p3 = por %p14_p2, %p13_p1 }
   0x8   :  { %p17_p5 = por %p16_p4, %p15_p3 }
   0xa   :  { %p18_p6 = pnand %p17_p5, %p11_p0 }
   0xc   :  { %21 = shalt.err (!%p18_p6)  }
   0xd   :  { %s22_s17 = scalar_lea.vmem %s5_s11, 256  ;;  %p27_p8 = scmp.lt.s32.totalorder %s5_s11, %s5_s11 }
   0xe   :  { %p23_p7 = scmp.ne.s32.totalorder %s5_s11, %s22_s17  ;;  %p28_p9 = scmp.lt.s32.totalorder %s22_s17, %s22_s17 }
  0x10   :  { %p29_p10 = por %p28_p9, %p27_p8 }
  0x12   :  { %p30_p11 = pnand %p29_p10, %p23_p7 }
  0x14   :  { %33 = shalt.err (!%p30_p11)  }
  0x15   :  { %7 = dma.hbm_to_vmem [thread:$0]  %s2_s8, 256, %s5_s11, [#allocation0] }
  0x16   :  { %35 = dma.done.wait [#allocation0], 256  }
  0x17   :  { %36 = vsyncadd [#allocation0], 4294967040 }
  0x18   :  { %9 = vsyncpa [#allocation0], 1 }

// kernel: custom-call
= control target key start
LH: loop header
LB: loop body
LE: loop exit
PB: predicated region body
PF: predicated region fallthrough
CT: control target
= control target key end

     0   :  { %2 = vsyncpa [#allocation0], 0  ;;  %s61_s0 = inlined_call_operand.hbm [shape: c64[2,2,2,2,8], index: 0, kind: input, shape index: {}]   ;;  %s62_s1 = inlined_call_operand.vmem [shape: f32[2,2,2,2,8], index: 1, kind: output, shape index: {}]  }
   0x1   :  { %s3_s8 = sshll.u32 %s62_s1, 4  ;;  %s9_s11 = scalar_lea.hbm %s61_s0, 256  ;;  %s4_s8 = int_to_ptr.vmem [resolvable:$true] %s3_s8 }
   0x2   :  { %p10_p0 = scmp.ne.s32.totalorder %s61_s0, %s9_s11  ;;  %s11_s16 = scalar_lea.hbm %s61_s0, 512 }
   0x3   :  { %p12_p1 = scmp.lt.u32.totalorder %s11_s16, %s9_s11  ;;  %p13_p2 = scmp.lt.u32.totalorder %s9_s11, %s61_s0 }
   0x5   :  { %p14_p3 = por %p13_p2, %p12_p1 }
   0x7   :  { %p15_p4 = pnand %p14_p3, %p10_p0 }
   0x9   :  { %18 = shalt.err (!%p15_p4)  }
   0xa   :  { %s19_s1 = scalar_lea.vmem %s4_s8, 256  ;;  %p24_p6 = scmp.lt.s32.totalorder %s4_s8, %s4_s8 }
   0xb   :  { %p20_p5 = scmp.ne.s32.totalorder %s4_s8, %s19_s1  ;;  %p25_p7 = scmp.lt.s32.totalorder %s19_s1, %s19_s1 }
   0xd   :  { %p26_p8 = por %p25_p7, %p24_p6 }
   0xf   :  { %p27_p9 = pnand %p26_p8, %p20_p5 }
  0x11   :  { %30 = shalt.err (!%p27_p9)  }
  0x12   :  { %6 = dma.hbm_to_vmem [thread:$0]  %s61_s0, 256, %s4_s8, [#allocation0] }
  0x13   :  { %31 = dma.done.wait [#allocation0], 256  }
  0x14   :  { %32 = vsyncadd [#allocation0], 4294967040 }
  0x15   :  { %8 = vsyncpa [#allocation0], 1 }

// kernel: custom-call.2
= control target key start
LH: loop header
LB: loop body
LE: loop exit
PB: predicated region body
PF: predicated region fallthrough
CT: control target
= control target key end

     0   :  { %s126_s0 = inlined_call_operand.vmem [shape: f32[2,2,2,2,8], index: 0, kind: input, shape index: {}]   ;;  %s127_s1 = inlined_call_operand.vmem [shape: f32[2,2,2,2,8], index: 1, kind: input, shape index: {}]   ;;  %s128_s2 = inlined_call_operand.hbm [shape: c64[2,2,2,2,8], index: 2, kind: output, shape index: {}]  }
   0x1   :  { %s87_s11 = scalar_lea.hbm %s128_s2, 256 }
   0x2   :  { %4 = vsyncpa [#allocation0], 0  ;;  %s5_s14 = sshll.u32 %s126_s0, 4  ;;  %s6_s14 = int_to_ptr.vmem [resolvable:$true] %s5_s14 }
   0x3   :  { %s18_s15 = scalar_lea.vmem %s6_s14, 256  ;;  %p23_p1 = scmp.lt.s32.totalorder %s6_s14, %s6_s14 }
   0x4   :  { %p19_p0 = scmp.ne.s32.totalorder %s6_s14, %s18_s15  ;;  %p24_p2 = scmp.lt.s32.totalorder %s18_s15, %s18_s15 }
   0x6   :  { %p25_p3 = por %p24_p2, %p23_p1 }
   0x8   :  { %p26_p4 = pnand %p25_p3, %p19_p0 }
   0xa   :  { %29 = shalt.err (!%p26_p4)  }
   0xb   :  { %p31_p5 = scmp.ne.s32.totalorder %s128_s2, %s87_s11  ;;  %s32_s0 = scalar_lea.hbm %s128_s2, 512 }
   0xc   :  { %p33_p6 = scmp.lt.u32.totalorder %s32_s0, %s87_s11  ;;  %p34_p7 = scmp.lt.u32.totalorder %s87_s11, %s128_s2 }
   0xe   :  { %p35_p8 = por %p34_p7, %p33_p6 }
  0x10   :  { %p36_p9 = pnand %p35_p8, %p31_p5 }
  0x12   :  { %39 = shalt.err (!%p36_p9)  }
  0x13   :  { %8 = dma.vmem_to_hbm [thread:$0]  %s6_s14, 256, %s128_s2, [#allocation0] }
  0x14   :  { %65 = dma.done.wait [#allocation0], 256  }
  0x15   :  { %66 = vsyncadd [#allocation0], 4294967040 }
  0x16   :  { %10 = vsyncpa [#allocation0], 1 }
  0x17   :  { %11 = vsyncpa [#allocation1], 0  ;;  %s12_s28 = sshll.u32 %s127_s1, 4  ;;  %s13_s28 = int_to_ptr.vmem [resolvable:$true] %s12_s28 }
  0x18   :  { %s40_s29 = scalar_lea.vmem %s13_s28, 256  ;;  %p45_p11 = scmp.lt.s32.totalorder %s13_s28, %s13_s28 }
  0x19   :  { %p41_p10 = scmp.ne.s32.totalorder %s13_s28, %s40_s29  ;;  %p46_p12 = scmp.lt.s32.totalorder %s40_s29, %s40_s29 }
  0x1b   :  { %p47_p13 = por %p46_p12, %p45_p11 }
  0x1d   :  { %p48_p0 = pnand %p47_p13, %p41_p10 }
  0x1f   :  { %51 = shalt.err (!%p48_p0)  }
  0x20   :  { %p53_p1 = scmp.ne.s32.totalorder %s87_s11, %s32_s0  ;;  %p56_p2 = scmp.lt.u32.totalorder %s32_s0, %s32_s0 }
  0x22   :  { %p57_p3 = por %p56_p2, %p34_p7 }
  0x24   :  { %p59_p4 = por %p57_p3, %p33_p6 }
  0x26   :  { %p60_p5 = pnand %p59_p4, %p53_p1 }
  0x28   :  { %63 = shalt.err (!%p60_p5)  }
  0x29   :  { %15 = dma.vmem_to_hbm [thread:$0]  %s13_s28, 256, %s87_s11, [#allocation1] }
  0x2a   :  { %67 = dma.done.wait [#allocation1], 256  }
  0x2b   :  { %68 = vsyncadd [#allocation1], 4294967040 }
  0x2c   :  { %17 = vsyncpa [#allocation1], 1 }

// kernel: forward.1
= control target key start
LH: loop header
LB: loop body
LE: loop exit
PB: predicated region body
PF: predicated region fallthrough
CT: control target
= control target key end

     0   :  { %v31_v0 = vlaneseq  ;;  %vm63_vm0 = vcmask 516096   ;;  %vm87_vm1 = vcmask 520196   ;;  %s183_s1 = inlined_call_operand.vmem [shape: f32[1,64], index: 1, kind: input, shape index: {}]   ;;  %s184_s2 = inlined_call_operand.vmem [shape: f32[1,64], index: 2, kind: input, shape index: {}]   ;;  %s185_s3 = inlined_call_operand.vmem [shape: f32[1,64], index: 3, kind: input, shape index: {}]   ;;  %s186_s4 = inlined_call_operand.vmem [shape: f32[1,64], index: 4, kind: input, shape index: {}]   ;;  %s187_s0 = inlined_call_operand.vmem [shape: f32[8,64], index: 0, kind: input, shape index: {}]   ;;  %s188_s5 = inlined_call_operand.vmem [shape: f32[1,64], index: 5, kind: output, shape index: {0}]   ;;  %s189_s6 = inlined_call_operand.vmem [shape: f32[1,64], index: 6, kind: output, shape index: {1}]   ;;  %s190_s7 = inlined_call_operand.vmem [shape: f32[1,64], index: 7, kind: output, shape index: {2}]   ;;  %s191_s8 = inlined_call_operand.vmem [shape: f32[1,64], index: 8, kind: output, shape index: {3}]  }
   0x1   :  { %v25_v1 = vld [vmem:[%s183_s1] sm:$0x1] }
   0x2   :  { %v32_v2 = vshrl.u32 %v31_v0, 7  ;;  %v26_v3 = vld [vmem:[%s184_s2] sm:$0x1] }
   0x3   :  { %v109_v4 = vld [vmem:[%s185_s3] ss:$0 sm:$0xff] }
   0x4   :  { %v110_v5 = vld [vmem:[%s186_s4] ss:$0 sm:$0xff]  ;;  %v33_v6 = vsub.s32 0, %v32_v2 }
   0x5   :  { %v24_v7 = vld [vmem:[%s187_s0] sm:$0xff] }
   0x6   :  { %v34_v8 = vrot.slane %v26_v3, %v33_v6  ;;  %v47_v9 = vmul.f32 %v109_v4, %v24_v7  ;;  %v58_v10 = vmul.f32 %v110_v5, %v24_v7  ;;  %v70_v11 = vrot.slane %v25_v1, %v33_v6 }
   0x7   :  { %v29_v12 = vmul.f32 %v25_v1, %v24_v7  ;;  %v65_v14 = vmul.f32 %v26_v3, %v24_v7 }
   0x8   :  { %v36_v13 = vmul.f32 %v34_v8, %v24_v7  ;;  %v72_v15 = vmul.f32 %v70_v11, %v24_v7  ;;  %v49_v17 = vrot.slane %v47_v9, 2  ;;  %v77_v19 = vrot.slane %v58_v10, 2 }
   0x9   :  { %v60_v20 = vrot.slane %v58_v10, 3  ;;  %v80_v21 = vrot.slane %v47_v9, 3 }
   0xa   :  { %v38_v16 = vrot.slane %v36_v13, 1  ;;  %v74_v18 = vrot.slane %v72_v15, 1 }
   0xc   :  { %v40_v22 = vsub.f32 %v29_v12, %v38_v16  ;;  %v76_v23 = vadd.f32 %v74_v18, %v65_v14  ;;  %v84_v24 = vsub.f32 %v72_v15, %v38_v16  ;;  %v89_v25 = vadd.f32 %v74_v18, %v36_v13 }
   0xe   :  { %v51_v26 = vadd.f32 %v49_v17, %v40_v22  ;;  %v79_v27 = vadd.f32 %v77_v19, %v76_v23  ;;  %v85_v28 = vadd.f32 %v84_v24, %v49_v17  ;;  %v90_v29 = vadd.f32 %v89_v25, %v77_v19 }
  0x10   :  { %v62_v30 = vsub.f32 %v51_v26, %v60_v20  ;;  %v82_v31 = vadd.f32 %v80_v21, %v79_v27  ;;  %v86_v32 = vsub.f32 %v85_v28, %v60_v20  ;;  %v91_v33 = vadd.f32 %v90_v29, %v80_v21 }
  0x12   :  { %64 = vst.msk [vmem:[%s188_s5] sm:$0x1] %vm63_vm0, %v62_v30  ;;  %83 = vst.msk [vmem:[%s189_s6] sm:$0x1] %vm63_vm0, %v82_v31 }
  0x13   :  { %88 = vst.msk [vmem:[%s190_s7 - $0x4] sm:$0x10] %vm87_vm1, %v86_v32  ;;  %92 = vst.msk [vmem:[%s191_s8 - $0x4] sm:$0x10] %vm87_vm1, %v91_v33 }

</bundles_post_ra>
